<compile_context>
chip_gen: v7x
topology: tpu7x:2x2x1
jax: 0.10.0
libtpu: 0.0.40
codegen_flags: <defaults>
</compile_context>

<pallas_src>
import jax
import jax.numpy as jnp
import numpy as np
from jax.experimental import pallas as pl
from jax.experimental.pallas import tpu as pltpu

MIB = 1024 * 1024


def _chamfer_kernel(p_ref, q_ref, out_ref):
    # p_ref: (bb, N, D) -- particles on sublanes, features on lanes.
    # q_ref: (bb, D, M) -- features on sublanes, particles (lane-dense).
    p = p_ref[...]
    q = q_ref[...]

    # Exact f32 squared norms, produced directly in the layouts the broadcast
    # below needs (pn: column over N-sublanes, qn: row over M-lanes), so no
    # cross-lane/sublane relayout is required.
    pn = jnp.sum(p * p, axis=-1, keepdims=True)   # (bb, N, 1)
    qn = jnp.sum(q * q, axis=1, keepdims=True)    # (bb, 1, M)

    # Cross term on the MXU in canonical batched-matmul form (no operand
    # transposes).  K = D = 6 underutilizes the MXU, but the MXU is otherwise
    # idle here and this keeps the per-element VPU cost to ~4 ops.
    dist = jnp.einsum("bnd,bdm->bnm", p, q,
                      preferred_element_type=jnp.float32)      # (bb, N, M)
    # Single fused accumulator chain over the one big (bb, N, M) buffer:
    # ||p||^2 + ||q||^2 - 2 p.q, clamped at 0 against fp cancellation.
    dist = jnp.maximum(pn + qn - 2.0 * dist, 0.0)

    min_pq = jnp.min(dist, axis=-1)   # min over q (lane reduce)    -> (bb, N)
    min_qp = jnp.min(dist, axis=-2)   # min over p (sublane reduce) -> (bb, M)

    # Lane-dense per-block partial sums: one (1, 1, bb) block per grid step.
    out_ref[...] = (
        jnp.sum(min_pq, axis=-1) + jnp.sum(min_qp, axis=-1)
    )[None, None, :]


def _p3_pointcloud(x, im):
    """x: (2, B, n, 4) complex 4-momenta -> (B, n, D) real features."""
    re3 = x[0, ..., 1:4]
    if im:
        return jnp.concatenate([re3, x[1, ..., 1:4]], axis=-1).astype(jnp.float32)
    return re3.astype(jnp.float32)


def _vmem_capacity_bytes():
    """Per-core VMEM capacity; falls back to the smallest (v7x) if unknown."""
    try:
        return int(pltpu.get_tpu_info().vmem_capacity_bytes)
    except Exception:
        return 64 * MIB


def _round_up(x, m):
    return ((int(x) + m - 1) // m) * m


def _footprint_bytes(bb, N, M, D):
    """Per-grid-step VMEM footprint using *padded* (sublane x lane) tile sizes."""
    f32 = 4
    lane = lambda x: _round_up(max(x, 1), 128)
    sub = lambda x: _round_up(max(x, 1), 8)
    p_blk = bb * sub(N) * lane(D) * f32      # (bb, N, D): D padded to 128 lanes
    q_blk = bb * sub(D) * lane(M) * f32      # (bb, D, M): lane-dense in M
    o_blk = sub(1) * lane(bb) * f32          # (1, 1, bb) partials block
    dist = bb * sub(N) * lane(M) * f32       # dominant intermediate
    pn = bb * sub(N) * 128 * f32             # (bb, N, 1) column (lane-padded)
    qn = bb * sub(1) * lane(M) * f32         # (bb, 1, M)
    mins = sub(bb) * (lane(N) + lane(M)) * f32
    # Inputs/outputs are double-buffered by the pipeline; budget ~2 live
    # dist-sized values for the fused elementwise chain; + 2 MiB slack.
    return 2 * (p_blk + q_blk + o_blk) + 2 * dist + pn + qn + mins + 2 * MIB


def _choose_block_batch(B, N, M, D, budget_bytes):
    """Largest batch tile whose padded footprint fits the VMEM budget."""
    bb = min(B, 512)
    if bb >= 8:
        bb = (bb // 8) * 8
    while bb > 1 and _footprint_bytes(bb, N, M, D) > budget_bytes:
        bb //= 2
    if 8 <= bb < B:
        bb = (bb // 8) * 8
    return max(1, min(bb, B))


def chamfer_loss(p, q, loss_norm_choice="p3", im=True, jet_features=False,
                 block_batch=None):
    """
    p: (2, B, N, 4) generated complex 4-momenta.
    q: (2, B, M, 4) or (B, M, 4) target 4-momenta.
    Returns scalar chamfer loss (float32), matching the 'p3' norm choice.
    """
    if p.ndim != 4 or p.shape[0] != 2:
        raise ValueError(f"Invalid dimension: {p.shape}")
    if q.ndim == 3:
        q = jnp.stack([q, jnp.zeros_like(q)], axis=0)   # convert_to_complex
    elif q.ndim != 4:
        raise ValueError(f"Invalid dimension: {q.shape}")
    if loss_norm_choice.lower() != "p3":
        # TODO(synk): only the default 'p3' norm choice is implemented here.
        raise NotImplementedError("Only loss_norm_choice='p3' is implemented.")
    if jet_features:
        # TODO(synk): jet_features branch (norm_sq of summed jets) not implemented.
        raise NotImplementedError("jet_features=True not implemented.")

    a = _p3_pointcloud(p, im)   # (B, Np, D)
    b = _p3_pointcloud(q, im)   # (B, Nq, D)
    # Chamfer loss is symmetric in (p, q): put the larger point cloud on the
    # 128-lane axis of the (bb, N, M) distance tensor so it stays lane-dense.
    if a.shape[1] > b.shape[1]:
        a, b = b, a
    pf = a                               # (B, N, D): particles -> sublanes
    qf = jnp.moveaxis(b, -1, -2)         # (B, D, M): particles -> lanes (dense)
    B, N, D = pf.shape
    M = qf.shape[-1]

    cap = _vmem_capacity_bytes()
    budget = max(16 * MIB, cap // 2 - 8 * MIB)       # ~24 MiB v7x, ~56 MiB v5e/v6e
    vmem_limit = max(32 * MIB, min(cap * 3 // 4, 2 * budget + 16 * MIB))

    if block_batch is not None:
        # Validate/round user-provided tile the same way the auto-chooser does.
        bb = max(1, min(int(block_batch), B))
        if bb >= 8:
            bb = (bb // 8) * 8
    else:
        bb = _choose_block_batch(B, N, M, D, budget)

    num_blocks = (B + bb - 1) // bb
    B_pad = num_blocks * bb
    if B_pad != B:
        # Zero-padded batches give an all-zero distance matrix -> contribute 0.
        pf = jnp.pad(pf, ((0, B_pad - B), (0, 0), (0, 0)))
        qf = jnp.pad(qf, ((0, B_pad - B), (0, 0), (0, 0)))

    partials = pl.pallas_call(
        _chamfer_kernel,
        out_shape=jax.ShapeDtypeStruct((num_blocks, 1, bb), jnp.float32),
        grid=(num_blocks,),
        in_specs=[
            pl.BlockSpec((bb, N, D), lambda i: (i, 0, 0)),
            pl.BlockSpec((bb, D, M), lambda i: (i, 0, 0)),
        ],
        out_specs=pl.BlockSpec((1, 1, bb), lambda i: (i, 0, 0)),
        compiler_params=pltpu.CompilerParams(
            # Each grid step reads/writes a distinct batch block, so the axis
            # is genuinely parallel (shards across v7x's 2 TensorCores).
            dimension_semantics=("parallel",),
            vmem_limit_bytes=int(vmem_limit),
        ),
    )(pf, qf)
    return jnp.sum(partials)


def _reference_chamfer(p, q, im=True):
    """Pure-JAX reference mirroring the PyTorch 'p3' semantics."""
    if q.ndim == 3:
        q = jnp.stack([q, jnp.zeros_like(q)], axis=0)
    diff = p[:, :, :, None, :] - q[:, :, None, :, :]  # (2, B, N, M, 4)
    if im:
        mag_sq = diff[0] ** 2 + diff[1] ** 2
    else:
        mag_sq = diff[0] ** 2
    dist = jnp.sum(mag_sq[..., 1:], axis=-1)  # (B, N, M)
    min_pq = jnp.min(dist, axis=-1)
    min_qp = jnp.min(dist, axis=-2)
    return jnp.sum(min_pq) + jnp.sum(min_qp)


if __name__ == "__main__":
    key = jax.random.PRNGKey(0)
    kp, kq, kp2, kq2 = jax.random.split(key, 4)

    # Test 1: small shapes; target given as real momenta (B, M, 4).
    B, N, M = 2, 8, 8
    p = jax.random.normal(kp, (2, B, N, 4), dtype=jnp.float32)
    q = jax.random.normal(kq, (B, M, 4), dtype=jnp.float32)

    loss = jax.block_until_ready(chamfer_loss(p, q))
    ref = jax.block_until_ready(_reference_chamfer(p, q))
    assert np.allclose(np.asarray(loss), np.asarray(ref), rtol=2e-3, atol=2e-3), (
        f"mismatch: kernel={loss} ref={ref}"
    )

    # Test 2: unaligned particle counts (exercises the p<->q lane-density
    # swap) + multi-block batch tiling with zero padding.
    B2, N2, M2 = 20, 12, 10
    p2 = jax.random.normal(kp2, (2, B2, N2, 4), dtype=jnp.float32)
    q2 = jax.random.normal(kq2, (2, B2, M2, 4), dtype=jnp.float32)

    loss2 = jax.block_until_ready(chamfer_loss(p2, q2, block_batch=8))
    ref2 = jax.block_until_ready(_reference_chamfer(p2, q2))
    assert np.allclose(np.asarray(loss2), np.asarray(ref2), rtol=2e-3, atol=2e-3), (
        f"mismatch: kernel={loss2} ref={ref2}"
    )

    print("KERNEL_OK")
</pallas_src>

<mosaic_0001>
module attributes {stable_mosaic.version = 11 : i64} {
  func.func @_chamfer_kernel(%arg0: i32, %arg1: memref<2x8x6xf32, #tpu.memory_space<vmem>>, %arg2: memref<2x6x8xf32, #tpu.memory_space<vmem>>, %arg3: memref<1x1x2xf32, #tpu.memory_space<vmem>>) attributes {dimension_semantics = [#tpu.dimension_semantics<parallel>], iteration_bounds = array<i64: 1>, scalar_prefetch = 0 : i64, scratch_operands = 0 : i64, tpu.core_type = #tpu.core_type<tc>, window_params = [{transform_indices = @transform_0, window_bounds = array<i64: 2, 8, 6>}, {transform_indices = @transform_1, window_bounds = array<i64: 2, 6, 8>}, {transform_indices = @transform_2, window_bounds = array<i64: 1, 1, 2>}]} {
    %c0 = arith.constant 0 : index
    %c0_0 = arith.constant 0 : index
    %c0_1 = arith.constant 0 : index
    %0 = vector.load %arg1[%c0, %c0_0, %c0_1] : memref<2x8x6xf32, #tpu.memory_space<vmem>>, vector<2x8x6xf32>
    %c0_2 = arith.constant 0 : index
    %c0_3 = arith.constant 0 : index
    %c0_4 = arith.constant 0 : index
    %1 = vector.load %arg2[%c0_2, %c0_3, %c0_4] : memref<2x6x8xf32, #tpu.memory_space<vmem>>, vector<2x6x8xf32>
    %2 = arith.mulf %0, %0 : vector<2x8x6xf32>
    %cst = arith.constant dense<0.000000e+00> : vector<2x8xf32>
    %3 = vector.multi_reduction <add>, %2, %cst [2] : vector<2x8x6xf32> to vector<2x8xf32>
    %4 = vector.shape_cast %3 : vector<2x8xf32> to vector<2x8x1xf32>
    %5 = arith.mulf %1, %1 : vector<2x6x8xf32>
    %cst_5 = arith.constant dense<0.000000e+00> : vector<2x8xf32>
    %6 = vector.multi_reduction <add>, %5, %cst_5 [1] : vector<2x6x8xf32> to vector<2x8xf32>
    %7 = vector.shape_cast %6 : vector<2x8xf32> to vector<2x1x8xf32>
    "tpu.trace_start"() <{level = 10 : i32, message = "bnd,bdm->bnm"}> : () -> ()
    %cst_6 = arith.constant dense<0.000000e+00> : vector<2x8x8xf32>
    %8 = tpu.matmul %0, %1, %cst_6 {dimension_numbers = #tpu.dot_dimension_numbers<[2], [1], [1], [2], [0, 0, 0, 1, 1, 2], [0], [0]>} : vector<2x8x6xf32>, vector<2x6x8xf32>, vector<2x8x8xf32> -> vector<2x8x8xf32>
    "tpu.trace_stop"() : () -> ()
    %9 = vector.broadcast %4 : vector<2x8x1xf32> to vector<2x8x8xf32>
    %10 = vector.broadcast %7 : vector<2x1x8xf32> to vector<2x8x8xf32>
    %11 = arith.addf %9, %10 : vector<2x8x8xf32>
    %cst_7 = arith.constant 2.000000e+00 : f32
    %12 = vector.broadcast %cst_7 : f32 to vector<2x8x8xf32>
    %13 = arith.mulf %12, %8 : vector<2x8x8xf32>
    %14 = arith.subf %11, %13 : vector<2x8x8xf32>
    %cst_8 = arith.constant 0.000000e+00 : f32
    %15 = vector.broadcast %cst_8 : f32 to vector<2x8x8xf32>
    %16 = arith.maximumf %14, %15 : vector<2x8x8xf32>
    %cst_9 = arith.constant dense<0x7F800000> : vector<2x8xf32>
    %17 = vector.multi_reduction <minimumf>, %16, %cst_9 [2] : vector<2x8x8xf32> to vector<2x8xf32>
    %cst_10 = arith.constant dense<0x7F800000> : vector<2x8xf32>
    %18 = vector.multi_reduction <minimumf>, %16, %cst_10 [1] : vector<2x8x8xf32> to vector<2x8xf32>
    %cst_11 = arith.constant dense<0.000000e+00> : vector<2xf32>
    %19 = vector.multi_reduction <add>, %17, %cst_11 [1] : vector<2x8xf32> to vector<2xf32>
    %cst_12 = arith.constant dense<0.000000e+00> : vector<2xf32>
    %20 = vector.multi_reduction <add>, %18, %cst_12 [1] : vector<2x8xf32> to vector<2xf32>
    %21 = arith.addf %19, %20 : vector<2xf32>
    %22 = vector.shape_cast %21 : vector<2xf32> to vector<1x1x2xf32>
    %c0_13 = arith.constant 0 : index
    %c0_14 = arith.constant 0 : index
    %c0_15 = arith.constant 0 : index
    %23 = vector.load %arg3[%c0_13, %c0_14, %c0_15] : memref<1x1x2xf32, #tpu.memory_space<vmem>>, vector<1x1x2xf32>
    tpu.vector_store %arg3[%c0_13, %c0_14, %c0_15], %22 {strides = array<i32>} : memref<1x1x2xf32, #tpu.memory_space<vmem>>, vector<1x1x2xf32>,
    return
  }
  func.func @transform_0(%arg0: i32) -> (i32, i32, i32) {
    %c0_i32 = arith.constant 0 : i32
    %c0_i32_0 = arith.constant 0 : i32
    %c0_i32_1 = arith.constant 0 : i32
    return %arg0, %c0_i32, %c0_i32_0 : i32, i32, i32
  }
  func.func @transform_1(%arg0: i32) -> (i32, i32, i32) {
    %c0_i32 = arith.constant 0 : i32
    %c0_i32_0 = arith.constant 0 : i32
    %c0_i32_1 = arith.constant 0 : i32
    return %arg0, %c0_i32, %c0_i32_0 : i32, i32, i32
  }
  func.func @transform_2(%arg0: i32) -> (i32, i32, i32) {
    %c0_i32 = arith.constant 0 : i32
    %c0_i32_0 = arith.constant 0 : i32
    %c0_i32_1 = arith.constant 0 : i32
    return %arg0, %c0_i32, %c0_i32_0 : i32, i32, i32
  }
}

</mosaic_0001>

<bundles_post_ra>
// kernel: tpu_custom_call.1
= control target key start
LH: loop header
LB: loop body
LE: loop exit
PB: predicated region body
PF: predicated region fallthrough
CT: control target
= control target key end

     0   :  { %vm45_vm0 = vcmask 1045504   ;;  %v316_v1 = vmov 0.0   ;;  %vm18_vm1 = vcmask 48128   ;;  %vm317_vm2 = vmmov 0   ;;  %s358_s0 = inlined_call_operand.vmem [shape: f32[2,8,6], index: 0, kind: input, shape index: {}]   ;;  %s359_s1 = inlined_call_operand.vmem [shape: f32[2,6,8], index: 1, kind: input, shape index: {}]   ;;  %s360_s2 = inlined_call_operand.hbm [shape: f32[1,1,2], index: 2, kind: output, shape index: {}]  }
   0x1   :  { %v14_v0 = vld [vmem:[%s359_s1] sm:$0x3f]  ;;  %279 = vmatprep.subr.mxu0 %v316_v1  ;;  %284 = vmatprep.subr.mxu1 %v316_v1  ;;  %v15_v2 = vld [vmem:[%s359_s1 + $0x8] sm:$0x3f] }
   0x2   :  { %v12_v3 = vld [vmem:[%s358_s0] sm:$0xff]  ;;  %v13_v4 = vld [vmem:[%s358_s0 + $0x8] sm:$0xff]  ;;  %280 = vmatpush3.msk.msra.mxu0 %vm45_vm0, %v14_v0  ;;  %281 = vmatprep.mubr.msk.f32.mxu0 %vm317_vm2, %v316_v1 }
   0x3   :  { %v16_v5 = vmul.f32 %v12_v3, %v12_v3  ;;  %v17_v6 = vmul.f32 %v13_v4, %v13_v4 }
   0x4   :  { %7 = vsyncpa [#allocation3], 0  ;;  %285 = vmatpush3.msk.msra.mxu1 %vm45_vm0, %v15_v2  ;;  %286 = vmatprep.mubr.msk.f32.mxu1 %vm317_vm2, %v316_v1  ;;  %v25_v9 = vmul.f32 %v14_v0, %v14_v0  ;;  %v26_v10 = vmul.f32 %v15_v2, %v15_v2  ;;  %vm27_vm3 = vcmask 62464   ;;  %vm203_vm4 = vcmask 64512   ;;  %s318_s0 = smov [#allocation2]  }
   0x5   :  { %282 = vmatmul.mubr.msk.f32.vlgmr.msra.gmra.mrb[0].mxu0 %vm18_vm1, %v12_v3  ;;  %287 = vmatmul.mubr.msk.f32.vlgmr.msra.gmra.mrb[0].mxu1 %vm18_vm1, %v13_v4  ;;  %v19_v7 = vsel %vm18_vm1, %v16_v5, 0.0  ;;  %v22_v8 = vsel %vm18_vm1, %v17_v6, 0.0  ;;  %vm234_vm5 = vcmask 1041409   ;;  %vm237_vm6 = vcmask 58368   ;;  %s263_s1 = sshll.u32 %s318_s0, 4  ;;  %s264_s1 = int_to_ptr.vmem [resolvable:$true] %s263_s1 }
   0x6   :  { %20 = vadd.xlane.f32.xlu0 %v19_v7  ;;  %v28_v11 = vsel %vm27_vm3, %v25_v9, 0.0  ;;  %v35_v12 = vsel %vm27_vm3, %v26_v10, 0.0  ;;  %v224_v55 = vlaneseq  ;;  %vm255_vm7 = vcmask 8192   ;;  %s292_s17 = scalar_lea.vmem %s264_s1, 16  ;;  %s296_s18 = scalar_lea.vmem %s264_s1, 32 }
   0x7   :  { %v29_v13 = vrot.slane %v28_v11, 4  ;;  %v36_v14 = vrot.slane %v35_v12, 4  ;;  %p293_p0 = scmp.ne.s32.totalorder %s264_s1, %s292_s17  ;;  %p297_p1 = scmp.lt.s32.totalorder %s264_s1, %s264_s1 }
   0x8   :  { %v225_v56 = vand.u32 127, %v224_v55  ;;  %v227_v57 = vshrl.u32 %v224_v55, 7  ;;  %p298_p2 = scmp.lt.s32.totalorder %s296_s18, %s292_s17 }
   0x9   :  { %v30_v15 = vadd.f32 %v29_v13, %v28_v11  ;;  %v37_v16 = vadd.f32 %v36_v14, %v35_v12 }
   0xa   :  { %23 = vadd.xlane.f32.xlu0 %v22_v8  ;;  %v228_v59 = vsub.s32 %v225_v56, %v227_v57  ;;  %p299_p3 = por %p298_p2, %p297_p1 }
   0xb   :  { %v31_v17 = vrot.slane %v30_v15, 2  ;;  %v38_v18 = vrot.slane %v37_v16, 2 }
   0xc   :  { %p300_p4 = pnand %p299_p3, %p293_p0 }
   0xd   :  { %v32_v19 = vadd.f32 %v31_v17, %v30_v15  ;;  %v39_v20 = vadd.f32 %v38_v18, %v37_v16 }
   0xf   :  { %v33_v22 = vrot.slane %v32_v19, 1  ;;  %v40_v23 = vrot.slane %v39_v20, 1 }
  0x11   :  { %v34_v24 = vadd.f32 %v33_v22, %v32_v19  ;;  %v41_v25 = vadd.f32 %v40_v23, %v39_v20 }
  0x93   :  { %v21_v21 = vpop.xlane.xlu0 %20 }
  0x94   :  { %v195_v27 = vadd.f32 %v34_v24, %v21_v21 }
  0x97   :  { %v24_v26 = vpop.xlane.xlu0 %23 }
  0x98   :  { %v196_v28 = vadd.f32 %v41_v25, %v24_v26 }
  0xd8   :  { %v115_v29 = vpop.f32.mrb[0].mxu0  ;;  %v191_v30 = vpop.f32.mrb[0].mxu1 }
  0xd9   :  { %v197_v31 = vmul.f32 2.0, %v115_v29  ;;  %v198_v32 = vmul.f32 2.0, %v191_v30  ;;  %v283_v33 = vpop.f32.mrb[1].mxu0  ;;  %v288_v34 = vpop.f32.mrb[1].mxu1 }
  0xdb   :  { %v199_v35 = vsub.f32 %v195_v27, %v197_v31  ;;  %v200_v36 = vsub.f32 %v196_v28, %v198_v32 }
  0xdd   :  { %v201_v37 = vmax.f32 %v199_v35, 0.0  ;;  %v202_v38 = vmax.f32 %v200_v36, 0.0 }
  0xdf   :  { %v204_v39 = vsel %vm203_vm4, %v201_v37, inf  ;;  %v207_v40 = vsel %vm203_vm4, %v202_v38, inf }
  0xe0   :  { %205 = vmin.xlane.f32.xlu1 %v204_v39  ;;  %v210_v41 = vrot.slane %v204_v39, 4  ;;  %v216_v42 = vrot.slane %v207_v40, 4 }
  0xe2   :  { %v211_v43 = vmin.f32 %v204_v39, %v210_v41  ;;  %v217_v44 = vmin.f32 %v207_v40, %v216_v42 }
  0xe4   :  { %v212_v45 = vrot.slane %v211_v43, 2  ;;  %208 = vmin.xlane.f32.xlu1 %v207_v40  ;;  %v218_v46 = vrot.slane %v217_v44, 2 }
  0xe6   :  { %v213_v47 = vmin.f32 %v211_v43, %v212_v45  ;;  %v219_v48 = vmin.f32 %v217_v44, %v218_v46 }
  0xe8   :  { %v214_v49 = vrot.slane %v213_v47, 1  ;;  %v220_v50 = vrot.slane %v219_v48, 1 }
  0xea   :  { %v215_v51 = vmin.f32 %v213_v47, %v214_v49  ;;  %v221_v52 = vmin.f32 %v219_v48, %v220_v50 }
  0xec   :  { %v243_v53 = vsel %vm234_vm5, %v221_v52, %v215_v51 }
  0xed   :  { %v245_v54 = vsel %vm237_vm6, %v243_v53, 0.0 }
  0xee   :  { %246 = vadd.xlane.f32.xlu1 %v245_v54 }
 0x16d   :  { %v206_v58 = vpop.xlane.xlu1 %205 }
 0x16e   :  { %v229_v61 = vrot.slane %v206_v58, %v228_v59 }
 0x171   :  { %v209_v60 = vpop.xlane.xlu1 %208 }
 0x172   :  { %v233_v62 = vrot.slane %v209_v60, %v228_v59 }
 0x174   :  { %v235_v63 = vsel %vm234_vm5, %v233_v62, %v229_v61 }
 0x175   :  { %v238_v0 = vsel %vm237_vm6, %v235_v63, 0.0 }
 0x176   :  { %239 = vadd.xlane.f32.xlu0 %v238_v0 }
 0x17b   :  { %v247_v1 = vpop.xlane.xlu1 %246 }
 0x203   :  { %v240_v2 = vpop.xlane.xlu0 %239 }
 0x204   :  { %v248_v3 = vadd.f32 %v247_v1, %v240_v2 }
 0x206   :  { %v253_v4 = vrot.slane %v248_v3, %v228_v59 }
 0x208   :  { %256 = vst.msk [vmem:[#allocation2] sm:$0x1] %vm255_vm7, %v253_v4 }
 0x209   :  { %303 = shalt.err (!%p300_p4)
}
 0x20a   :  { %s304_s21 = scalar_lea.hbm %s360_s2, 16 }
 0x20b   :  { %p305_p5 = scmp.ne.s32.totalorder %s360_s2, %s304_s21  ;;  %p308_p6 = scmp.lt.u32.totalorder %s304_s21, %s360_s2 }
 0x20d   :  { %p310_p7 = pnand %p308_p6, %p305_p5 }
 0x20f   :  { %313 = shalt.err (!%p310_p7)
}
 0x210   :  { %266 = dma.vmem_to_hbm [thread:$0]  %s264_s1, 16, %s360_s2, [#allocation3]  }
 0x211   :  { %314 = dma.done.wait [#allocation3], 16  }
 0x212   :  { %315 = vsyncadd [#allocation3], 4294967280 }
 0x213   :  { %270 = vsyncpa [#allocation3], 1 }

</bundles_post_ra>
